<compile_context>
chip_gen: v7x
topology: tpu7x:2x2x1
jax: 0.10.0
libtpu: 0.0.40
codegen_flags: <defaults>
</compile_context>

<pallas_src>
import functools

import jax
import jax.numpy as jnp
from jax.experimental import pallas as pl
from jax.experimental.pallas import tpu as pltpu

IN_FEATURES = 4096


def _round_up(v, m):
    return ((v + m - 1) // m) * m


def _largest_divisor_leq(n, m):
    """Largest divisor of n that is <= m (and >= 1)."""
    m = max(1, min(m, n))
    for t in range(m, 0, -1):
        if n % t == 0:
            return t
    return 1


def _chip_config():
    """Best-effort per-generation budgets (conservative defaults if detection fails)."""
    kind = ""
    try:
        kind = (jax.devices()[0].device_kind or "").lower()
    except Exception:
        pass
    if "v7" in kind:
        # v7x: 64 MiB VMEM per TensorCore, 2 TCs per chip -> keep headroom for compiler scratch.
        return {"cores": 2, "vmem_cap": 44 * 1024 * 1024, "vmem_limit_max": 56 * 1024 * 1024}
    # v5e / v6e (and older): 1 TensorCore, 128 MiB physical VMEM.
    return {"cores": 1, "vmem_cap": 80 * 1024 * 1024, "vmem_limit_max": 100 * 1024 * 1024}


# ----------------------------------------------------------------------------- kernels

def _projector_kernel_accout(x_ref, w1_ref, b1_ref, w2_ref, b2_ref, o_ref):
    """f32 output: accumulate the hidden-dim reduction directly into o_ref."""
    j = pl.program_id(2)

    h = jnp.dot(x_ref[...], w1_ref[...], preferred_element_type=jnp.float32)
    h = jnp.maximum(h + b1_ref[...], 0.0)          # bias + ReLU in f32
    # dropout(p=0.1): identity (eval/inference semantics)
    d = jnp.dot(h.astype(w2_ref.dtype), w2_ref[...],
                preferred_element_type=jnp.float32)

    @pl.when(j == 0)
    def _():
        o_ref[...] = d

    @pl.when(j > 0)
    def _():
        o_ref[...] += d

    @pl.when(j == pl.num_programs(2) - 1)
    def _():
        o_ref[...] += b2_ref[...]


def _projector_kernel_scratch(x_ref, w1_ref, b1_ref, w2_ref, b2_ref, o_ref, acc_ref):
    """Non-f32 output: f32 scratch accumulator, cast + bias at the last reduction step."""
    j = pl.program_id(2)

    h = jnp.dot(x_ref[...], w1_ref[...], preferred_element_type=jnp.float32)
    h = jnp.maximum(h + b1_ref[...], 0.0)
    # dropout(p=0.1): identity (eval/inference semantics)
    d = jnp.dot(h.astype(w2_ref.dtype), w2_ref[...],
                preferred_element_type=jnp.float32)

    @pl.when(j == 0)
    def _():
        acc_ref[...] = d

    @pl.when(j > 0)
    def _():
        acc_ref[...] += d

    @pl.when(j == pl.num_programs(2) - 1)
    def _():
        o_ref[...] = (acc_ref[...] + b2_ref[...]).astype(o_ref.dtype)


# ----------------------------------------------------------------------------- wrapper

def prepare_params(w1, b1, w2, b2, compute_dtype=jnp.bfloat16):
    """One-time weight cast + pad (hoisted out of the per-call forward).

    w1: [4096, H], b1: [H], w2: [H, H], b2: [H]  ->  bf16/padded weights, f32 biases.
    Call once and reuse the result across forward calls.
    """
    hidden = w1.shape[1]
    hp = _round_up(hidden, 128)
    w1_p = jnp.pad(w1.astype(compute_dtype), ((0, 0), (0, hp - hidden)))
    w2_p = jnp.pad(w2.astype(compute_dtype), ((0, hp - hidden), (0, hp - hidden)))
    b1_p = jnp.pad(b1.astype(jnp.float32), (0, hp - hidden)).reshape(1, hp)
    b2_p = jnp.pad(b2.astype(jnp.float32), (0, hp - hidden)).reshape(1, hp)
    return w1_p, b1_p, w2_p, b2_p


@functools.partial(jax.jit, static_argnames=("hidden", "block_rows", "block_hidden"))
def projector_forward(x, w1_p, b1_p, w2_p, b2_p, *,
                      hidden, block_rows=512, block_hidden=512):
    """x: [..., 4096]; (w1_p, b1_p, w2_p, b2_p) from prepare_params -> [..., hidden]."""
    out_dtype = x.dtype
    lead_shape = x.shape[:-1]
    x2d = x.reshape(-1, IN_FEATURES)
    n, k = x2d.shape
    assert k == IN_FEATURES
    hp = w1_p.shape[1]

    cd = w1_p.dtype
    cd_size = jnp.dtype(cd).itemsize
    out_size = jnp.dtype(out_dtype).itemsize
    sub = 16 if cd_size == 2 else 8                      # sublane packing multiple

    cfg = _chip_config()
    ntiles = hp // 128
    use_scratch = out_dtype != jnp.float32

    # ---- tile selection --------------------------------------------------------
    # Hidden (reduction) tile: largest 128-multiple divisor of hp <= block_hidden.
    tn = 128 * _largest_divisor_leq(ntiles, max(1, block_hidden // 128))

    # Row tile: as large as the batch allows (weights are re-read once per row tile).
    tm = min(_round_up(block_rows, sub), _round_up(n, sub))
    n_pad = _round_up(n, tm)
    grid_rows = n_pad // tm

    # Output-column tile: full width unless we need VMEM bounding or core parallelism.
    to_tiles = ntiles
    if cfg["cores"] > 1 and grid_rows < cfg["cores"]:
        # Small batch on a multi-TensorCore chip: split output columns so both TCs work.
        to_tiles = _largest_divisor_leq(ntiles, max(1, ntiles // cfg["cores"]))

    def _footprint(tm_, to_tiles_):
        to_ = 128 * to_tiles_
        return (2 * tm_ * k * cd_size          # x tile, double-buffered
                + 2 * k * tn * cd_size         # W1 slab
                + 2 * tn * 4                   # b1 slab
                + 2 * tn * to_ * cd_size       # W2 slab
                + 2 * to_ * 4                  # b2 slab
                + 2 * tm_ * to_ * out_size     # output tile
                + (tm_ * to_ * 4 if use_scratch else 0))

    # Shrink output-column tile, then row tile, until the footprint fits this generation.
    while _footprint(tm, to_tiles) > cfg["vmem_cap"] and to_tiles > 1:
        to_tiles = _largest_divisor_leq(ntiles, to_tiles // 2)
    while _footprint(tm, to_tiles) > cfg["vmem_cap"] and tm > sub:
        tm = max(sub, _round_up(tm // 2, sub))
    n_pad = _round_up(n, tm)
    grid_rows = n_pad // tm
    to = 128 * to_tiles
    grid_out = ntiles // to_tiles
    grid_hid = hp // tn

    # ---- pad + cast activations (only x is touched per call) -------------------
    x_c = x2d.astype(cd)
    if n_pad != n:
        x_c = jnp.pad(x_c, ((0, n_pad - n), (0, 0)))

    # ---- VMEM budget & cost hints ----------------------------------------------
    fp = _footprint(tm, to_tiles)
    vmem_limit = int(min(cfg["vmem_limit_max"], max(fp * 5 // 4, 16 * 1024 * 1024)))

    cost = pl.CostEstimate(
        flops=grid_out * 2 * n_pad * k * hp + 2 * n_pad * hp * hp,
        transcendentals=0,
        bytes_accessed=(n_pad * k * cd_size + n_pad * hp * out_size
                        + grid_rows * grid_out * (k * hp * cd_size + hp * 4)
                        + grid_rows * (hp * hp * cd_size + hp * 4)),
    )

    kernel = _projector_kernel_scratch if use_scratch else _projector_kernel_accout
    scratch = (pltpu.VMEM((tm, to), jnp.float32),) if use_scratch else ()

    out = pl.pallas_call(
        kernel,
        out_shape=jax.ShapeDtypeStruct((n_pad, hp), out_dtype),
        grid_spec=pltpu.PrefetchScalarGridSpec(
            num_scalar_prefetch=0,
            grid=(grid_rows, grid_out, grid_hid),
            in_specs=[
                pl.BlockSpec((tm, k), lambda i, o, j: (i, 0)),    # x rows (reused over o, j)
                pl.BlockSpec((k, tn), lambda i, o, j: (0, j)),    # W1 hidden slab
                pl.BlockSpec((1, tn), lambda i, o, j: (0, j)),    # b1 slab
                pl.BlockSpec((tn, to), lambda i, o, j: (j, o)),   # W2 (hidden, out-col) slab
                pl.BlockSpec((1, to), lambda i, o, j: (0, o)),    # b2 out-col slab
            ],
            out_specs=pl.BlockSpec((tm, to), lambda i, o, j: (i, o)),
            scratch_shapes=scratch,
        ),
        compiler_params=pltpu.CompilerParams(
            dimension_semantics=("parallel", "parallel", "arbitrary"),
            vmem_limit_bytes=vmem_limit,
        ),
        cost_estimate=cost,
    )(x_c, w1_p, b1_p, w2_p, b2_p)

    return out[:n, :hidden].reshape(lead_shape + (hidden,))


# ----------------------------------------------------------------------------- helpers

def init_params(key, hidden_size, dtype=jnp.float32):
    """Deterministic init mirroring nn.Linear shapes.

    torch stores Linear weight as [out, in]; we keep the transposed [in, out]
    layout so the kernel computes x @ W directly.
    """
    k1, k2, k3, k4 = jax.random.split(key, 4)
    bound1 = 1.0 / (IN_FEATURES ** 0.5)
    bound2 = 1.0 / (hidden_size ** 0.5)
    w1 = jax.random.uniform(k1, (IN_FEATURES, hidden_size), dtype,
                            minval=-bound1, maxval=bound1)
    b1 = jax.random.uniform(k2, (hidden_size,), dtype,
                            minval=-bound1, maxval=bound1)
    w2 = jax.random.uniform(k3, (hidden_size, hidden_size), dtype,
                            minval=-bound2, maxval=bound2)
    b2 = jax.random.uniform(k4, (hidden_size,), dtype,
                            minval=-bound2, maxval=bound2)
    return w1, b1, w2, b2


def reference_forward(x, w1, b1, w2, b2, compute_dtype=jnp.float32):
    """Pure-JAX reference mirroring the kernel's casts (f32 accumulation)."""
    lead = x.shape[:-1]
    x2d = x.reshape(-1, IN_FEATURES).astype(compute_dtype)
    h = jnp.dot(x2d, w1.astype(compute_dtype), preferred_element_type=jnp.float32)
    h = jnp.maximum(h + b1.astype(jnp.float32), 0.0)
    out = jnp.dot(h.astype(compute_dtype), w2.astype(compute_dtype),
                  preferred_element_type=jnp.float32) + b2.astype(jnp.float32)
    return out.astype(x.dtype).reshape(lead + (w1.shape[1],))


if __name__ == "__main__":
    key = jax.random.PRNGKey(0)
    hidden_size = 32
    batch, seq = 2, 4                 # forward treats x as [..., 4096]

    kx, kp = jax.random.split(key)
    x = jax.random.normal(kx, (batch, seq, IN_FEATURES), jnp.float32)
    w1, b1, w2, b2 = init_params(kp, hidden_size)

    # One-time weight cast/pad (hoisted out of the per-call forward).
    params = prepare_params(w1, b1, w2, b2)
    params = jax.block_until_ready(params)

    out = projector_forward(x, *params, hidden=hidden_size)   # bf16 matmuls, f32 accum
    out = jax.block_until_ready(out)
    assert out.shape == (batch, seq, hidden_size)

    ref_match = reference_forward(x, w1, b1, w2, b2, compute_dtype=jnp.bfloat16)
    ref_f32 = reference_forward(x, w1, b1, w2, b2, compute_dtype=jnp.float32)
    assert jnp.allclose(out, ref_match, atol=1e-2, rtol=1e-2), "mismatch vs bf16 reference"
    assert jnp.allclose(out, ref_f32, atol=5e-2, rtol=5e-2), "mismatch vs f32 reference"

    print("KERNEL_OK")
</pallas_src>

<mosaic_0001>
module attributes {stable_mosaic.version = 11 : i64} {
  func.func @_projector_kernel_accout(%arg0: i32, %arg1: i32, %arg2: i32, %arg3: memref<16x4096xbf16, #tpu.memory_space<vmem>>, %arg4: memref<4096x128xbf16, #tpu.memory_space<vmem>>, %arg5: memref<1x128xf32, #tpu.memory_space<vmem>>, %arg6: memref<128x128xbf16, #tpu.memory_space<vmem>>, %arg7: memref<1x128xf32, #tpu.memory_space<vmem>>, %arg8: memref<16x128xf32, #tpu.memory_space<vmem>>) attributes {dimension_semantics = [#tpu.dimension_semantics<parallel>, #tpu.dimension_semantics<parallel>, #tpu.dimension_semantics<arbitrary>], iteration_bounds = array<i64: 1, 1, 1>, scalar_prefetch = 0 : i64, scratch_operands = 0 : i64, tpu.core_type = #tpu.core_type<tc>, window_params = [{transform_indices = @transform_0, window_bounds = array<i64: 16, 4096>}, {transform_indices = @transform_1, window_bounds = array<i64: 4096, 128>}, {transform_indices = @transform_2, window_bounds = array<i64: 1, 128>}, {transform_indices = @transform_3, window_bounds = array<i64: 128, 128>}, {transform_indices = @transform_4, window_bounds = array<i64: 1, 128>}, {transform_indices = @transform_5, window_bounds = array<i64: 16, 128>}]} {
    %c0 = arith.constant 0 : index
    %c0_0 = arith.constant 0 : index
    %0 = vector.load %arg3[%c0, %c0_0] : memref<16x4096xbf16, #tpu.memory_space<vmem>>, vector<16x4096xbf16>
    %c0_1 = arith.constant 0 : index
    %c0_2 = arith.constant 0 : index
    %1 = vector.load %arg4[%c0_1, %c0_2] : memref<4096x128xbf16, #tpu.memory_space<vmem>>, vector<4096x128xbf16>
    %cst = arith.constant dense<0.000000e+00> : vector<16x128xf32>
    %2 = tpu.matmul %0, %1, %cst {dimension_numbers = #tpu.dot_dimension_numbers<[1], [0], [0], [1], [0, 0, 1, 1], [], []>} : vector<16x4096xbf16>, vector<4096x128xbf16>, vector<16x128xf32> -> vector<16x128xf32>
    %c0_3 = arith.constant 0 : index
    %c0_4 = arith.constant 0 : index
    %3 = vector.load %arg5[%c0_3, %c0_4] : memref<1x128xf32, #tpu.memory_space<vmem>>, vector<1x128xf32>
    %4 = vector.broadcast %3 : vector<1x128xf32> to vector<16x128xf32>
    %5 = arith.addf %2, %4 : vector<16x128xf32>
    %cst_5 = arith.constant 0.000000e+00 : f32
    %6 = vector.broadcast %cst_5 : f32 to vector<16x128xf32>
    %7 = arith.maximumf %5, %6 : vector<16x128xf32>
    %8 = arith.truncf %7 : vector<16x128xf32> to vector<16x128xbf16>
    %c0_6 = arith.constant 0 : index
    %c0_7 = arith.constant 0 : index
    %9 = vector.load %arg6[%c0_6, %c0_7] : memref<128x128xbf16, #tpu.memory_space<vmem>>, vector<128x128xbf16>
    %cst_8 = arith.constant dense<0.000000e+00> : vector<16x128xf32>
    %10 = tpu.matmul %8, %9, %cst_8 {dimension_numbers = #tpu.dot_dimension_numbers<[1], [0], [0], [1], [0, 0, 1, 1], [], []>} : vector<16x128xbf16>, vector<128x128xbf16>, vector<16x128xf32> -> vector<16x128xf32>
    %c0_i32 = arith.constant 0 : i32
    %11 = arith.cmpi eq, %arg2, %c0_i32 : i32
    %12 = arith.extui %11 : i1 to i32
    %c0_i32_9 = arith.constant 0 : i32
    %13 = arith.cmpi ne, %12, %c0_i32_9 : i32
    scf.if %13 {
      %c0_14 = arith.constant 0 : index
      %c0_15 = arith.constant 0 : index
      %20 = vector.load %arg8[%c0_14, %c0_15] : memref<16x128xf32, #tpu.memory_space<vmem>>, vector<16x128xf32>
      tpu.vector_store %arg8[%c0_14, %c0_15], %10 {strides = array<i32>} : memref<16x128xf32, #tpu.memory_space<vmem>>, vector<16x128xf32>,
    } else {
    }
    %c0_i32_10 = arith.constant 0 : i32
    %14 = arith.cmpi sgt, %arg2, %c0_i32_10 : i32
    %15 = arith.extui %14 : i1 to i32
    %c0_i32_11 = arith.constant 0 : i32
    %16 = arith.cmpi ne, %15, %c0_i32_11 : i32
    scf.if %16 {
      %c0_14 = arith.constant 0 : index
      %c0_15 = arith.constant 0 : index
      %20 = vector.load %arg8[%c0_14, %c0_15] : memref<16x128xf32, #tpu.memory_space<vmem>>, vector<16x128xf32>
      %21 = arith.addf %20, %10 : vector<16x128xf32>
      %c0_16 = arith.constant 0 : index
      %c0_17 = arith.constant 0 : index
      %22 = vector.load %arg8[%c0_16, %c0_17] : memref<16x128xf32, #tpu.memory_space<vmem>>, vector<16x128xf32>
      tpu.vector_store %arg8[%c0_16, %c0_17], %21 {strides = array<i32>} : memref<16x128xf32, #tpu.memory_space<vmem>>, vector<16x128xf32>,
    } else {
    }
    %c0_i32_12 = arith.constant 0 : i32
    %17 = arith.cmpi eq, %arg2, %c0_i32_12 : i32
    %18 = arith.extui %17 : i1 to i32
    %c0_i32_13 = arith.constant 0 : i32
    %19 = arith.cmpi ne, %18, %c0_i32_13 : i32
    scf.if %19 {
      %c0_14 = arith.constant 0 : index
      %c0_15 = arith.constant 0 : index
      %20 = vector.load %arg8[%c0_14, %c0_15] : memref<16x128xf32, #tpu.memory_space<vmem>>, vector<16x128xf32>
      %c0_16 = arith.constant 0 : index
      %c0_17 = arith.constant 0 : index
      %21 = vector.load %arg7[%c0_16, %c0_17] : memref<1x128xf32, #tpu.memory_space<vmem>>, vector<1x128xf32>
      %22 = vector.broadcast %21 : vector<1x128xf32> to vector<16x128xf32>
      %23 = arith.addf %20, %22 : vector<16x128xf32>
      %c0_18 = arith.constant 0 : index
      %c0_19 = arith.constant 0 : index
      %24 = vector.load %arg8[%c0_18, %c0_19] : memref<16x128xf32, #tpu.memory_space<vmem>>, vector<16x128xf32>
      tpu.vector_store %arg8[%c0_18, %c0_19], %23 {strides = array<i32>} : memref<16x128xf32, #tpu.memory_space<vmem>>, vector<16x128xf32>,
    } else {
    }
    return
  }
  func.func @transform_0(%arg0: i32, %arg1: i32, %arg2: i32) -> (i32, i32) {
    %c0_i32 = arith.constant 0 : i32
    %c0_i32_0 = arith.constant 0 : i32
    return %arg0, %c0_i32 : i32, i32
  }
  func.func @transform_1(%arg0: i32, %arg1: i32, %arg2: i32) -> (i32, i32) {
    %c0_i32 = arith.constant 0 : i32
    %c0_i32_0 = arith.constant 0 : i32
    return %c0_i32, %arg2 : i32, i32
  }
  func.func @transform_2(%arg0: i32, %arg1: i32, %arg2: i32) -> (i32, i32) {
    %c0_i32 = arith.constant 0 : i32
    %c0_i32_0 = arith.constant 0 : i32
    return %c0_i32, %arg2 : i32, i32
  }
  func.func @transform_3(%arg0: i32, %arg1: i32, %arg2: i32) -> (i32, i32) {
    %c0_i32 = arith.constant 0 : i32
    return %arg2, %arg1 : i32, i32
  }
  func.func @transform_4(%arg0: i32, %arg1: i32, %arg2: i32) -> (i32, i32) {
    %c0_i32 = arith.constant 0 : i32
    %c0_i32_0 = arith.constant 0 : i32
    return %c0_i32, %arg1 : i32, i32
  }
  func.func @transform_5(%arg0: i32, %arg1: i32, %arg2: i32) -> (i32, i32) {
    %c0_i32 = arith.constant 0 : i32
    return %arg0, %arg1 : i32, i32
  }
}

</mosaic_0001>

<bundles_post_ra>
// kernel: projector_forward.1
= control target key start
LH: loop header
LB: loop body
LE: loop exit
PB: predicated region body
PF: predicated region fallthrough
CT: control target
= control target key end

     0   :  { %10 = vsyncpa [#allocation3], 0  ;;  %s4055_s18 = smov [#allocation2]   ;;  %s4234_s0 = inlined_call_operand.vmem [shape: bf16[16,4096], index: 0, kind: input, shape index: {}]   ;;  %s4235_s1 = inlined_call_operand.hbm [shape: bf16[4096,128], index: 1, kind: input, shape index: {}]   ;;  %s4236_s2 = inlined_call_operand.vmem [shape: f32[1,128], index: 2, kind: input, shape index: {}]   ;;  %s4237_s3 = inlined_call_operand.vmem [shape: bf16[128,128], index: 3, kind: input, shape index: {}]   ;;  %s4238_s4 = inlined_call_operand.vmem [shape: f32[1,128], index: 4, kind: input, shape index: {}]   ;;  %s4239_s5 = inlined_call_operand.vmem [shape: f32[16,128], index: 5, kind: output, shape index: {}]  }
   0x1   :  { %s18_s19 = sshll.u32 %s4055_s18, 4  ;;  %s4031_s22 = scalar_lea.hbm %s4235_s1, 32768  ;;  %s19_s19 = int_to_ptr.vmem [resolvable:$true] %s18_s19 }
   0x2   :  { %p4032_p0 = scmp.ne.s32.totalorder %s4235_s1, %s4031_s22  ;;  %p4035_p1 = scmp.lt.u32.totalorder %s4031_s22, %s4235_s1 }
   0x4   :  { %p4037_p2 = pnand %p4035_p1, %p4032_p0 }
   0x6   :  { %4040 = shalt.err (!%p4037_p2)
}
   0x7   :  { %s4041_s27 = scalar_lea.vmem %s19_s19, 32768  ;;  %p4046_p4 = scmp.lt.s32.totalorder %s19_s19, %s19_s19 }
   0x8   :  { %p4042_p3 = scmp.ne.s32.totalorder %s19_s19, %s4041_s27  ;;  %p4047_p5 = scmp.lt.s32.totalorder %s4041_s27, %s4041_s27 }
   0xa   :  { %p4048_p6 = por %p4047_p5, %p4046_p4 }
   0xc   :  { %p4049_p7 = pnand %p4048_p6, %p4042_p3 }
   0xe   :  { %4052 = shalt.err (!%p4049_p7)
}
   0xf   :  { %s4056_s28 = smov 64   ;;  %s4057_s29 = smov 4  }
  0x10   :  { %24 = dma.hbm_to_vmem [thread:$0]  %s4235_s1, 32768, %s19_s19, [#allocation3], %s4056_s28, %s4056_s28, %s4057_s29  }
  0x11   :  { %4053 = dma.done.wait [#allocation3], 32768  }
  0x12   :  { %4054 = vsyncadd [#allocation3], 4294934528  ;;  %v3767_v0 = vld [vmem:[#allocation2 + $0x40] sm:$0xff]   ;;  %v3771_v4 = vld [vmem:[#allocation2 + $0x48] sm:$0xff]   ;;  %vm4059_vm0 = vmmov 0  }
  0x13   :  { %v3768_v1 = vld [vmem:[#allocation2 + $0xc0] sm:$0xff]   ;;  %3381 = vmatprep.subr.bf16.mxu0 %v3767_v0  ;;  %v3772_v5 = vld [vmem:[#allocation2 + $0xc8] sm:$0xff]   ;;  %v3775_v8 = vld [vmem:[#allocation2 + $0x50] sm:$0xff]  }
  0x14   :  { %v3769_v2 = vld [vmem:[#allocation2] sm:$0xff]   ;;  %3403 = vmatprep.subr.bf16.mxu1 %v3768_v1  ;;  %v3773_v6 = vld [vmem:[#allocation2 + $0x8] sm:$0xff]   ;;  %v3776_v9 = vld [vmem:[#allocation2 + $0xd0] sm:$0xff]  }
  0x15   :  { %v3770_v3 = vld [vmem:[#allocation2 + $0x80] sm:$0xff]   ;;  %3382 = vmatpush3.bf16.msra.mxu0 %v3769_v2  ;;  %v3774_v7 = vld [vmem:[#allocation2 + $0x88] sm:$0xff]   ;;  %v3777_v10 = vld [vmem:[#allocation2 + $0x10] sm:$0xff]  }
  0x16   :  { %3404 = vmatpush3.bf16.msra.mxu1 %v3770_v3  ;;  %3383 = vmatprep.subr.bf16.mxu0 %v3771_v4  ;;  %v3778_v11 = vld [vmem:[#allocation2 + $0x90] sm:$0xff]   ;;  %v3779_v12 = vld [vmem:[#allocation2 + $0x58] sm:$0xff]   ;;  %v3783_v16 = vld [vmem:[#allocation2 + $0x60] sm:$0xff]  }
  0x17   :  { %3405 = vmatprep.subr.bf16.mxu1 %v3772_v5  ;;  %v3780_v13 = vld [vmem:[#allocation2 + $0xd8] sm:$0xff]   ;;  %v3784_v17 = vld [vmem:[#allocation2 + $0xe0] sm:$0xff]   ;;  %v3787_v20 = vld [vmem:[#allocation2 + $0x68] sm:$0xff]  }
  0x18   :  { %v3781_v14 = vld [vmem:[#allocation2 + $0x18] sm:$0xff]   ;;  %v3785_v18 = vld [vmem:[#allocation2 + $0x20] sm:$0xff]   ;;  %v3788_v21 = vld [vmem:[#allocation2 + $0xe8] sm:$0xff]  }
  0x19   :  { %3384 = vmatpush3.bf16.msra.mxu0 %v3773_v6  ;;  %v3782_v15 = vld [vmem:[#allocation2 + $0x98] sm:$0xff]   ;;  %v3786_v19 = vld [vmem:[#allocation2 + $0xa0] sm:$0xff]   ;;  %v3789_v22 = vld [vmem:[#allocation2 + $0x28] sm:$0xff]  }
  0x1a   :  { %3406 = vmatpush3.bf16.msra.mxu1 %v3774_v7  ;;  %3385 = vmatprep.subr.bf16.mxu0 %v3775_v8  ;;  %v3790_v23 = vld [vmem:[#allocation2 + $0xa8] sm:$0xff]   ;;  %v3791_v24 = vld [vmem:[#allocation2 + $0x70] sm:$0xff]   ;;  %v3795_v28 = vld [vmem:[#allocation2 + $0x78] sm:$0xff]  }
  0x1b   :  { %3407 = vmatprep.subr.bf16.mxu1 %v3776_v9  ;;  %v3792_v25 = vld [vmem:[#allocation2 + $0xf0] sm:$0xff]   ;;  %v3796_v29 = vld [vmem:[#allocation2 + $0xf8] sm:$0xff]   ;;  %v35_v32 = vld [vmem:[%s4234_s0] sm:$0xff] }
  0x1c   :  { %v3793_v26 = vld [vmem:[#allocation2 + $0x30] sm:$0xff]   ;;  %v3797_v30 = vld [vmem:[#allocation2 + $0x38] sm:$0xff]   ;;  %v51_v33 = vld [vmem:[%s4234_s0 + $0x80] sm:$0xff] }
  0x1d   :  { %3386 = vmatpush3.bf16.msra.mxu0 %v3777_v10  ;;  %v3794_v27 = vld [vmem:[#allocation2 + $0xb0] sm:$0xff]   ;;  %v3798_v31 = vld [vmem:[#allocation2 + $0xb8] sm:$0xff]   ;;  %v36_v34 = vld [vmem:[%s4234_s0 + $0x8] sm:$0xff]  ;;  %v3084_v35 = vcombine.low %v35_v32, %v51_v33  ;;  %v3085_v36 = vcombine.high %v35_v32, %v51_v33 }
  0x1e   :  { %3408 = vmatpush3.bf16.msra.mxu1 %v3778_v11  ;;  %3387 = vmatprep.subr.bf16.mxu0 %v3779_v12  ;;  %v52_v37 = vld [vmem:[%s4234_s0 + $0x88] sm:$0xff]  ;;  %v3799_v40 = vld [vmem:[#allocation2 + $0x140] sm:$0xff]   ;;  %v3807_v48 = vld [vmem:[#allocation2 + $0x150] sm:$0xff]  }
  0x1f   :  { %3409 = vmatprep.subr.bf16.mxu1 %v3780_v13  ;;  %v3086_v38 = vcombine.low %v36_v34, %v52_v37  ;;  %v3087_v39 = vcombine.high %v36_v34, %v52_v37  ;;  %2314 = vmatprep.mubr.bf16.mxu0 %v3085_v36  ;;  %v3800_v41 = vld [vmem:[#allocation2 + $0x1c0] sm:$0xff]   ;;  %v3803_v44 = vld [vmem:[#allocation2 + $0x148] sm:$0xff]   ;;  %v3808_v49 = vld [vmem:[#allocation2 + $0x1d0] sm:$0xff]  }
  0x20   :  { %v3801_v42 = vld [vmem:[#allocation2 + $0x100] sm:$0xff]   ;;  %v3804_v45 = vld [vmem:[#allocation2 + $0x1c8] sm:$0xff]   ;;  %v3809_v50 = vld [vmem:[#allocation2 + $0x110] sm:$0xff]  }
  0x21   :  { %3388 = vmatpush3.bf16.msra.mxu0 %v3781_v14  ;;  %2355 = vmatprep.mubr.bf16.mxu1 %v3087_v39  ;;  %v3802_v43 = vld [vmem:[#allocation2 + $0x180] sm:$0xff]   ;;  %v3805_v46 = vld [vmem:[#allocation2 + $0x108] sm:$0xff]   ;;  %v3810_v51 = vld [vmem:[#allocation2 + $0x190] sm:$0xff]  }
  0x22   :  { %3410 = vmatpush3.bf16.msra.mxu1 %v3782_v15  ;;  %3389 = vmatprep.subr.bf16.mxu0 %v3783_v16  ;;  %v3806_v47 = vld [vmem:[#allocation2 + $0x188] sm:$0xff]   ;;  %v3811_v52 = vld [vmem:[#allocation2 + $0x158] sm:$0xff]   ;;  %v3815_v56 = vld [vmem:[#allocation2 + $0x160] sm:$0xff]  }
  0x23   :  { %3411 = vmatprep.subr.bf16.mxu1 %v3784_v17  ;;  %v3812_v53 = vld [vmem:[#allocation2 + $0x1d8] sm:$0xff]   ;;  %v3816_v57 = vld [vmem:[#allocation2 + $0x1e0] sm:$0xff]   ;;  %v3819_v60 = vld [vmem:[#allocation2 + $0x168] sm:$0xff]  }
  0x24   :  { %v3813_v54 = vld [vmem:[#allocation2 + $0x118] sm:$0xff]   ;;  %v3817_v58 = vld [vmem:[#allocation2 + $0x120] sm:$0xff]   ;;  %v3820_v61 = vld [vmem:[#allocation2 + $0x1e8] sm:$0xff]  }
  0x25   :  { %3390 = vmatpush3.bf16.msra.mxu0 %v3785_v18  ;;  %v3814_v55 = vld [vmem:[#allocation2 + $0x198] sm:$0xff]   ;;  %v3818_v59 = vld [vmem:[#allocation2 + $0x1a0] sm:$0xff]   ;;  %v3821_v62 = vld [vmem:[#allocation2 + $0x128] sm:$0xff]  }
  0x26   :  { %3412 = vmatpush3.bf16.msra.mxu1 %v3786_v19  ;;  %3391 = vmatprep.subr.bf16.mxu0 %v3787_v20  ;;  %v3822_v63 = vld [vmem:[#allocation2 + $0x1a8] sm:$0xff]   ;;  %v3823_v0 = vld [vmem:[#allocation2 + $0x170] sm:$0xff]   ;;  %v3827_v4 = vld [vmem:[#allocation2 + $0x178] sm:$0xff]  }
  0x27   :  { %3413 = vmatprep.subr.bf16.mxu1 %v3788_v21  ;;  %v3824_v1 = vld [vmem:[#allocation2 + $0x1f0] sm:$0xff]   ;;  %v3828_v5 = vld [vmem:[#allocation2 + $0x1f8] sm:$0xff]   ;;  %v3831_v16 = vld [vmem:[#allocation2 + $0x240] sm:$0xff]  }
  0x28   :  { %v3825_v2 = vld [vmem:[#allocation2 + $0x130] sm:$0xff]   ;;  %v3829_v6 = vld [vmem:[#allocation2 + $0x138] sm:$0xff]   ;;  %v3832_v17 = vld [vmem:[#allocation2 + $0x2c0] sm:$0xff]  }
  0x29   :  { %3392 = vmatpush3.bf16.msra.mxu0 %v3789_v22  ;;  %v3826_v3 = vld [vmem:[#allocation2 + $0x1b0] sm:$0xff]   ;;  %v3830_v7 = vld [vmem:[#allocation2 + $0x1b8] sm:$0xff]   ;;  %v3833_v18 = vld [vmem:[#allocation2 + $0x200] sm:$0xff]  }
  0x2a   :  { %3414 = vmatpush3.bf16.msra.mxu1 %v3790_v23  ;;  %3393 = vmatprep.subr.bf16.mxu0 %v3791_v24  ;;  %v37_v8 = vld [vmem:[%s4234_s0 + $0x10] sm:$0xff]  ;;  %v38_v12 = vld [vmem:[%s4234_s0 + $0x18] sm:$0xff]  ;;  %v3834_v19 = vld [vmem:[#allocation2 + $0x280] sm:$0xff]  }
  0x2b   :  { %3415 = vmatprep.subr.bf16.mxu1 %v3792_v25  ;;  %v53_v9 = vld [vmem:[%s4234_s0 + $0x90] sm:$0xff]  ;;  %v54_v13 = vld [vmem:[%s4234_s0 + $0x98] sm:$0xff]  ;;  %v3835_v20 = vld [vmem:[#allocation2 + $0x248] sm:$0xff]  }
  0x2c   :  { %v3088_v10 = vcombine.low %v37_v8, %v53_v9  ;;  %v3089_v11 = vcombine.high %v37_v8, %v53_v9  ;;  %v3090_v14 = vcombine.low %v38_v12, %v54_v13  ;;  %v3091_v15 = vcombine.high %v38_v12, %v54_v13  ;;  %v3836_v21 = vld [vmem:[#allocation2 + $0x2c8] sm:$0xff]   ;;  %v3839_v24 = vld [vmem:[#allocation2 + $0x250] sm:$0xff]   ;;  %v3847_v32 = vld [vmem:[#allocation2 + $0x260] sm:$0xff]  }
  0x2d   :  { %3394 = vmatpush3.bf16.msra.mxu0 %v3793_v26  ;;  %v3837_v22 = vld [vmem:[#allocation2 + $0x208] sm:$0xff]   ;;  %v3840_v25 = vld [vmem:[#allocation2 + $0x2d0] sm:$0xff]   ;;  %v3848_v33 = vld [vmem:[#allocation2 + $0x2e0] sm:$0xff]  }
  0x2e   :  { %3416 = vmatpush3.bf16.msra.mxu1 %v3794_v27  ;;  %3395 = vmatprep.subr.bf16.mxu0 %v3795_v28  ;;  %v3838_v23 = vld [vmem:[#allocation2 + $0x288] sm:$0xff]   ;;  %v3841_v26 = vld [vmem:[#allocation2 + $0x210] sm:$0xff]   ;;  %v3843_v28 = vld [vmem:[#allocation2 + $0x258] sm:$0xff]  }
  0x2f   :  { %3417 = vmatprep.subr.bf16.mxu1 %v3796_v29  ;;  %v3842_v27 = vld [vmem:[#allocation2 + $0x290] sm:$0xff]   ;;  %v3844_v29 = vld [vmem:[#allocation2 + $0x2d8] sm:$0xff]   ;;  %v3849_v34 = vld [vmem:[#allocation2 + $0x220] sm:$0xff]  }
  0x30   :  { %v3851_v36 = vld [vmem:[#allocation2 + $0x268] sm:$0xff]   ;;  %v3879_v8 = vld [vmem:[#allocation2 + $0x360] sm:$0xff]  }
  0x31   :  { %3396 = vmatpush3.bf16.msra.mxu0 %v3797_v30  ;;  %v3845_v30 = vld [vmem:[#allocation2 + $0x218] sm:$0xff]   ;;  %v3852_v37 = vld [vmem:[#allocation2 + $0x2e8] sm:$0xff]   ;;  %v3880_v9 = vld [vmem:[#allocation2 + $0x3e0] sm:$0xff]  }
  0x32   :  { %3418 = vmatpush3.bf16.msra.mxu1 %v3798_v31  ;;  %3425 = vmatprep.subr.bf16.mxu0 %v3799_v40  ;;  %v3846_v31 = vld [vmem:[#allocation2 + $0x298] sm:$0xff]   ;;  %v3854_v39 = vld [vmem:[#allocation2 + $0x2a8] sm:$0xff]   ;;  %v3855_v40 = vld [vmem:[#allocation2 + $0x270] sm:$0xff]  }
  0x33   :  { %3447 = vmatprep.subr.bf16.mxu1 %v3800_v41  ;;  %v3856_v41 = vld [vmem:[#allocation2 + $0x2f0] sm:$0xff]   ;;  %v3883_v12 = vld [vmem:[#allocation2 + $0x368] sm:$0xff]  }
  0x34   :  { %2315 = vmatmul.mubr.bf16.vlgmr.msra.gmra.mrb[0].mxu0 %v3084_v35  ;;  %v3850_v35 = vld [vmem:[#allocation2 + $0x2a0] sm:$0xff]   ;;  %v3884_v13 = vld [vmem:[#allocation2 + $0x3e8] sm:$0xff]  }
  0x35   :  { %2356 = vmatmul.mubr.bf16.vlgmr.msra.gmra.mrb[0].mxu1 %v3086_v38  ;;  %3426 = vmatpush3.bf16.msra.mxu0 %v3801_v42  ;;  %v3853_v38 = vld [vmem:[#allocation2 + $0x228] sm:$0xff]   ;;  %v3857_v42 = vld [vmem:[#allocation2 + $0x230] sm:$0xff]  }
  0x36   :  { %3448 = vmatpush3.bf16.msra.mxu1 %v3802_v43  ;;  %3427 = vmatprep.subr.bf16.mxu0 %v3803_v44  ;;  %v3858_v43 = vld [vmem:[#allocation2 + $0x2b0] sm:$0xff]   ;;  %v3859_v44 = vld [vmem:[#allocation2 + $0x278] sm:$0xff]  }
  0x37   :  { %3449 = vmatprep.subr.bf16.mxu1 %v3804_v45  ;;  %2396 = vmatprep.mubr.bf16.mxu0 %v3089_v11  ;;  %v3860_v45 = vld [vmem:[#allocation2 + $0x2f8] sm:$0xff]   ;;  %v3882_v11 = vld [vmem:[#allocation2 + $0x3a0] sm:$0xff]  }
  0x38   :  { %2437 = vmatprep.mubr.bf16.mxu1 %v3091_v15  ;;  %v3886_v15 = vld [vmem:[#allocation2 + $0x3a8] sm:$0xff]  }
  0x39   :  { %3428 = vmatpush3.bf16.msra.mxu0 %v3805_v46  ;;  %v3861_v46 = vld [vmem:[#allocation2 + $0x238] sm:$0xff]  }
  0x3a   :  { %3450 = vmatpush3.bf16.msra.mxu1 %v3806_v47  ;;  %3429 = vmatprep.subr.bf16.mxu0 %v3807_v48  ;;  %v3862_v47 = vld [vmem:[#allocation2 + $0x2b8] sm:$0xff]   ;;  %v39_v48 = vld [vmem:[%s4234_s0 + $0x20] sm:$0xff] }
  0x3b   :  { %3451 = vmatprep.subr.bf16.mxu1 %v3808_v49  ;;  %v55_v49 = vld [vmem:[%s4234_s0 + $0xa0] sm:$0xff] }
  0x3d   :  { %3430 = vmatpush3.bf16.msra.mxu0 %v3809_v50  ;;  %v40_v50 = vld [vmem:[%s4234_s0 + $0x28] sm:$0xff] }
  0x3e   :  { %3452 = vmatpush3.bf16.msra.mxu1 %v3810_v51  ;;  %3431 = vmatprep.subr.bf16.mxu0 %v3811_v52  ;;  %v56_v51 = vld [vmem:[%s4234_s0 + $0xa8] sm:$0xff]  ;;  %v3092_v52 = vcombine.low %v39_v48, %v55_v49 }
  0x3f   :  { %3453 = vmatprep.subr.bf16.mxu1 %v3812_v53  ;;  %v3093_v53 = vcombine.high %v39_v48, %v55_v49  ;;  %v3911_v48 = vld [vmem:[#allocation2 + $0x460] sm:$0xff]  }
  0x40   :  { %v3912_v49 = vld [vmem:[#allocation2 + $0x4e0] sm:$0xff]  }
  0x41   :  { %3432 = vmatpush3.bf16.msra.mxu0 %v3813_v54  ;;  %v3094_v54 = vcombine.low %v40_v50, %v56_v51 }
  0x42   :  { %3454 = vmatpush3.bf16.msra.mxu1 %v3814_v55  ;;  %3433 = vmatprep.subr.bf16.mxu0 %v3815_v56  ;;  %v3095_v55 = vcombine.high %v40_v50, %v56_v51  ;;  %v3863_v56 = vld [vmem:[#allocation2 + $0x340] sm:$0xff]  }
  0x43   :  { %3455 = vmatprep.subr.bf16.mxu1 %v3816_v57  ;;  %v3864_v57 = vld [vmem:[#allocation2 + $0x3c0] sm:$0xff]  }
  0x44   :  { %v3913_v50 = vld [vmem:[#allocation2 + $0x420] sm:$0xff]  }
  0x45   :  { %3434 = vmatpush3.bf16.msra.mxu0 %v3817_v58  ;;  %v3865_v58 = vld [vmem:[#allocation2 + $0x300] sm:$0xff]  }
  0x46   :  { %3456 = vmatpush3.bf16.msra.mxu1 %v3818_v59  ;;  %3435 = vmatprep.subr.bf16.mxu0 %v3819_v60  ;;  %v3866_v59 = vld [vmem:[#allocation2 + $0x380] sm:$0xff]   ;;  %v3867_v60 = vld [vmem:[#allocation2 + $0x348] sm:$0xff]  }
  0x47   :  { %3457 = vmatprep.subr.bf16.mxu1 %v3820_v61  ;;  %v3868_v61 = vld [vmem:[#allocation2 + $0x3c8] sm:$0xff]   ;;  %v3914_v51 = vld [vmem:[#allocation2 + $0x4a0] sm:$0xff]  }
  0x49   :  { %3436 = vmatpush3.bf16.msra.mxu0 %v3821_v62  ;;  %v3869_v62 = vld [vmem:[#allocation2 + $0x308] sm:$0xff]  }
  0x4a   :  { %3458 = vmatpush3.bf16.msra.mxu1 %v3822_v63  ;;  %3437 = vmatprep.subr.bf16.mxu0 %v3823_v0  ;;  %v3870_v63 = vld [vmem:[#allocation2 + $0x388] sm:$0xff]   ;;  %v3871_v0 = vld [vmem:[#allocation2 + $0x350] sm:$0xff]  }
  0x4b   :  { %3459 = vmatprep.subr.bf16.mxu1 %v3824_v1  ;;  %v3872_v1 = vld [vmem:[#allocation2 + $0x3d0] sm:$0xff]  }
  0x4d   :  { %3438 = vmatpush3.bf16.msra.mxu0 %v3825_v2  ;;  %v3873_v2 = vld [vmem:[#allocation2 + $0x310] sm:$0xff]  }
  0x4e   :  { %3460 = vmatpush3.bf16.msra.mxu1 %v3826_v3  ;;  %3439 = vmatprep.subr.bf16.mxu0 %v3827_v4  ;;  %v3874_v3 = vld [vmem:[#allocation2 + $0x390] sm:$0xff]   ;;  %v3875_v4 = vld [vmem:[#allocation2 + $0x358] sm:$0xff]  }
  0x4f   :  { %3461 = vmatprep.subr.bf16.mxu1 %v3828_v5  ;;  %v3876_v5 = vld [vmem:[#allocation2 + $0x3d8] sm:$0xff]  }
  0x51   :  { %3440 = vmatpush3.bf16.msra.mxu0 %v3829_v6  ;;  %v3877_v6 = vld [vmem:[#allocation2 + $0x318] sm:$0xff]  }
  0x52   :  { %3462 = vmatpush3.bf16.msra.mxu1 %v3830_v7  ;;  %3469 = vmatprep.subr.bf16.mxu0 %v3831_v16  ;;  %v3878_v7 = vld [vmem:[#allocation2 + $0x398] sm:$0xff]   ;;  %v3887_v16 = vld [vmem:[#allocation2 + $0x370] sm:$0xff]  }
  0x53   :  { %3491 = vmatprep.subr.bf16.mxu1 %v3832_v17  ;;  %v3888_v17 = vld [vmem:[#allocation2 + $0x3f0] sm:$0xff]  }
  0x54   :  { %2397 = vmatmul.mubr.bf16.vlgmr.msra.gmra.mrb[4].mxu0 %v3088_v10  ;;  %v3881_v10 = vld [vmem:[#allocation2 + $0x320] sm:$0xff]  }
  0x55   :  { %2438 = vmatmul.mubr.bf16.vlgmr.msra.gmra.mrb[4].mxu1 %v3090_v14  ;;  %3470 = vmatpush3.bf16.msra.mxu0 %v3833_v18  ;;  %v3885_v14 = vld [vmem:[#allocation2 + $0x328] sm:$0xff]   ;;  %v3889_v18 = vld [vmem:[#allocation2 + $0x330] sm:$0xff]  }
  0x56   :  { %3492 = vmatpush3.bf16.msra.mxu1 %v3834_v19  ;;  %3471 = vmatprep.subr.bf16.mxu0 %v3835_v20  ;;  %v3890_v19 = vld [vmem:[#allocation2 + $0x3b0] sm:$0xff]   ;;  %v3891_v20 = vld [vmem:[#allocation2 + $0x378] sm:$0xff]  }
  0x57   :  { %3493 = vmatprep.subr.bf16.mxu1 %v3836_v21  ;;  %2478 = vmatprep.mubr.bf16.mxu0 %v3093_v53  ;;  %v3892_v21 = vld [vmem:[#allocation2 + $0x3f8] sm:$0xff]   ;;  %v3916_v53 = vld [vmem:[#allocation2 + $0x4e8] sm:$0xff]  }
  0x58   :  { %2519 = vmatprep.mubr.bf16.mxu1 %v3095_v55  ;;  %v3918_v55 = vld [vmem:[#allocation2 + $0x4a8] sm:$0xff]  }
  0x59   :  { %3472 = vmatpush3.bf16.msra.mxu0 %v3837_v22  ;;  %v3893_v22 = vld [vmem:[#allocation2 + $0x338] sm:$0xff]  }
  0x5a   :  { %3494 = vmatpush3.bf16.msra.mxu1 %v3838_v23  ;;  %3473 = vmatprep.subr.bf16.mxu0 %v3839_v24  ;;  %v3894_v23 = vld [vmem:[#allocation2 + $0x3b8] sm:$0xff]   ;;  %v41_v24 = vld [vmem:[%s4234_s0 + $0x30] sm:$0xff] }
  0x5b   :  { %3495 = vmatprep.subr.bf16.mxu1 %v3840_v25  ;;  %v57_v25 = vld [vmem:[%s4234_s0 + $0xb0] sm:$0xff] }
  0x5d   :  { %3474 = vmatpush3.bf16.msra.mxu0 %v3841_v26  ;;  %v42_v26 = vld [vmem:[%s4234_s0 + $0x38] sm:$0xff] }
  0x5e   :  { %3496 = vmatpush3.bf16.msra.mxu1 %v3842_v27  ;;  %3475 = vmatprep.subr.bf16.mxu0 %v3843_v28  ;;  %v3096_v27 = vcombine.low %v41_v24, %v57_v25  ;;  %v3097_v28 = vcombine.high %v41_v24, %v57_v25  ;;  %v3943_v24 = vld [vmem:[#allocation2 + $0x560] sm:$0xff]  }
  0x5f   :  { %3497 = vmatprep.subr.bf16.mxu1 %v3844_v29  ;;  %v58_v29 = vld [vmem:[%s4234_s0 + $0xb8] sm:$0xff]  ;;  %v3944_v25 = vld [vmem:[#allocation2 + $0x5e0] sm:$0xff]  }
  0x61   :  { %3476 = vmatpush3.bf16.msra.mxu0 %v3845_v30  ;;  %v3098_v30 = vcombine.low %v42_v26, %v58_v29 }
  0x62   :  { %3498 = vmatpush3.bf16.msra.mxu1 %v3846_v31  ;;  %3477 = vmatprep.subr.bf16.mxu0 %v3847_v32  ;;  %v3099_v31 = vcombine.high %v42_v26, %v58_v29  ;;  %v3895_v32 = vld [vmem:[#allocation2 + $0x440] sm:$0xff]   ;;  %v3948_v29 = vld [vmem:[#allocation2 + $0x5e8] sm:$0xff]  }
  0x63   :  { %3499 = vmatprep.subr.bf16.mxu1 %v3848_v33  ;;  %v3896_v33 = vld [vmem:[#allocation2 + $0x4c0] sm:$0xff]  }
  0x64   :  { %v3945_v26 = vld [vmem:[#allocation2 + $0x520] sm:$0xff]  }
  0x65   :  { %3478 = vmatpush3.bf16.msra.mxu0 %v3849_v34  ;;  %v3897_v34 = vld [vmem:[#allocation2 + $0x400] sm:$0xff]  }
  0x66   :  { %3500 = vmatpush3.bf16.msra.mxu1 %v3850_v35  ;;  %3479 = vmatprep.subr.bf16.mxu0 %v3851_v36  ;;  %v3898_v35 = vld [vmem:[#allocation2 + $0x480] sm:$0xff]   ;;  %v3899_v36 = vld [vmem:[#allocation2 + $0x448] sm:$0xff]  }
  0x67   :  { %3501 = vmatprep.subr.bf16.mxu1 %v3852_v37  ;;  %v3900_v37 = vld [vmem:[#allocation2 + $0x4c8] sm:$0xff]  }
  0x69   :  { %3480 = vmatpush3.bf16.msra.mxu0 %v3853_v38  ;;  %v3901_v38 = vld [vmem:[#allocation2 + $0x408] sm:$0xff]  }
  0x6a   :  { %3502 = vmatpush3.bf16.msra.mxu1 %v3854_v39  ;;  %3481 = vmatprep.subr.bf16.mxu0 %v3855_v40  ;;  %v3902_v39 = vld [vmem:[#allocation2 + $0x488] sm:$0xff]   ;;  %v3903_v40 = vld [vmem:[#allocation2 + $0x450] sm:$0xff]  }
  0x6b   :  { %3503 = vmatprep.subr.bf16.mxu1 %v3856_v41  ;;  %v3904_v41 = vld [vmem:[#allocation2 + $0x4d0] sm:$0xff]  }
  0x6d   :  { %3482 = vmatpush3.bf16.msra.mxu0 %v3857_v42  ;;  %v3905_v42 = vld [vmem:[#allocation2 + $0x410] sm:$0xff]  }
  0x6e   :  { %3504 = vmatpush3.bf16.msra.mxu1 %v3858_v43  ;;  %3483 = vmatprep.subr.bf16.mxu0 %v3859_v44  ;;  %v3906_v43 = vld [vmem:[#allocation2 + $0x490] sm:$0xff]   ;;  %v3907_v44 = vld [vmem:[#allocation2 + $0x458] sm:$0xff]  }
  0x6f   :  { %3505 = vmatprep.subr.bf16.mxu1 %v3860_v45  ;;  %v3908_v45 = vld [vmem:[#allocation2 + $0x4d8] sm:$0xff]  }
  0x71   :  { %3484 = vmatpush3.bf16.msra.mxu0 %v3861_v46  ;;  %v3909_v46 = vld [vmem:[#allocation2 + $0x418] sm:$0xff]  }
  0x72   :  { %3506 = vmatpush3.bf16.msra.mxu1 %v3862_v47  ;;  %3513 = vmatprep.subr.bf16.mxu0 %v3863_v56  ;;  %v3910_v47 = vld [vmem:[#allocation2 + $0x498] sm:$0xff]   ;;  %v3919_v56 = vld [vmem:[#allocation2 + $0x470] sm:$0xff]  }
  0x73   :  { %3535 = vmatprep.subr.bf16.mxu1 %v3864_v57  ;;  %v3920_v57 = vld [vmem:[#allocation2 + $0x4f0] sm:$0xff]  }
  0x74   :  { %2479 = vmatmul.mubr.bf16.vlgmr.msra.gmra.mrb[8].mxu0 %v3092_v52  ;;  %v3915_v52 = vld [vmem:[#allocation2 + $0x468] sm:$0xff]  }
  0x75   :  { %2520 = vmatmul.mubr.bf16.vlgmr.msra.gmra.mrb[8].mxu1 %v3094_v54  ;;  %3514 = vmatpush3.bf16.msra.mxu0 %v3865_v58  ;;  %v3917_v54 = vld [vmem:[#allocation2 + $0x428] sm:$0xff]   ;;  %v3921_v58 = vld [vmem:[#allocation2 + $0x430] sm:$0xff]  }
  0x76   :  { %3536 = vmatpush3.bf16.msra.mxu1 %v3866_v59  ;;  %3515 = vmatprep.subr.bf16.mxu0 %v3867_v60  ;;  %v3922_v59 = vld [vmem:[#allocation2 + $0x4b0] sm:$0xff]   ;;  %v3923_v60 = vld [vmem:[#allocation2 + $0x478] sm:$0xff]  }
  0x77   :  { %3537 = vmatprep.subr.bf16.mxu1 %v3868_v61  ;;  %2560 = vmatprep.mubr.bf16.mxu0 %v3097_v28  ;;  %v3924_v61 = vld [vmem:[#allocation2 + $0x4f8] sm:$0xff]   ;;  %v3947_v28 = vld [vmem:[#allocation2 + $0x568] sm:$0xff]  }
  0x78   :  { %2601 = vmatprep.mubr.bf16.mxu1 %v3099_v31  ;;  %v3950_v31 = vld [vmem:[#allocation2 + $0x5a8] sm:$0xff]  }
  0x79   :  { %3516 = vmatpush3.bf16.msra.mxu0 %v3869_v62  ;;  %v3925_v62 = vld [vmem:[#allocation2 + $0x438] sm:$0xff]  }
  0x7a   :  { %3538 = vmatpush3.bf16.msra.mxu1 %v3870_v63  ;;  %3517 = vmatprep.subr.bf16.mxu0 %v3871_v0  ;;  %v3926_v63 = vld [vmem:[#allocation2 + $0x4b8] sm:$0xff]   ;;  %v43_v0 = vld [vmem:[%s4234_s0 + $0x40] sm:$0xff] }
  0x7b   :  { %3539 = vmatprep.subr.bf16.mxu1 %v3872_v1  ;;  %v59_v1 = vld [vmem:[%s4234_s0 + $0xc0] sm:$0xff] }
  0x7d   :  { %3518 = vmatpush3.bf16.msra.mxu0 %v3873_v2  ;;  %v3100_v2 = vcombine.low %v43_v0, %v59_v1 }
  0x7e   :  { %3540 = vmatpush3.bf16.msra.mxu1 %v3874_v3  ;;  %3519 = vmatprep.subr.bf16.mxu0 %v3875_v4  ;;  %v3101_v3 = vcombine.high %v43_v0, %v59_v1  ;;  %v44_v4 = vld [vmem:[%s4234_s0 + $0x48] sm:$0xff]  ;;  %v3975_v0 = vld [vmem:[#allocation2 + $0x660] sm:$0xff]  }
  0x7f   :  { %3541 = vmatprep.subr.bf16.mxu1 %v3876_v5  ;;  %v60_v5 = vld [vmem:[%s4234_s0 + $0xc8] sm:$0xff]  ;;  %v3976_v1 = vld [vmem:[#allocation2 + $0x6e0] sm:$0xff]  }
  0x81   :  { %3520 = vmatpush3.bf16.msra.mxu0 %v3877_v6  ;;  %v3102_v6 = vcombine.low %v44_v4, %v60_v5 }
  0x82   :  { %3542 = vmatpush3.bf16.msra.mxu1 %v3878_v7  ;;  %3521 = vmatprep.subr.bf16.mxu0 %v3879_v8  ;;  %v3103_v7 = vcombine.high %v44_v4, %v60_v5  ;;  %v3927_v8 = vld [vmem:[#allocation2 + $0x540] sm:$0xff]   ;;  %v3979_v4 = vld [vmem:[#allocation2 + $0x668] sm:$0xff]  }
  0x83   :  { %3543 = vmatprep.subr.bf16.mxu1 %v3880_v9  ;;  %v3928_v9 = vld [vmem:[#allocation2 + $0x5c0] sm:$0xff]   ;;  %v3980_v5 = vld [vmem:[#allocation2 + $0x6e8] sm:$0xff]  }
  0x85   :  { %3522 = vmatpush3.bf16.msra.mxu0 %v3881_v10  ;;  %v3929_v10 = vld [vmem:[#allocation2 + $0x500] sm:$0xff]  }
  0x86   :  { %3544 = vmatpush3.bf16.msra.mxu1 %v3882_v11  ;;  %3523 = vmatprep.subr.bf16.mxu0 %v3883_v12  ;;  %v3930_v11 = vld [vmem:[#allocation2 + $0x580] sm:$0xff]   ;;  %v3931_v12 = vld [vmem:[#allocation2 + $0x548] sm:$0xff]  }
  0x87   :  { %3545 = vmatprep.subr.bf16.mxu1 %v3884_v13  ;;  %v3932_v13 = vld [vmem:[#allocation2 + $0x5c8] sm:$0xff]  }
  0x89   :  { %3524 = vmatpush3.bf16.msra.mxu0 %v3885_v14  ;;  %v3933_v14 = vld [vmem:[#allocation2 + $0x508] sm:$0xff]  }
  0x8a   :  { %3546 = vmatpush3.bf16.msra.mxu1 %v3886_v15  ;;  %3525 = vmatprep.subr.bf16.mxu0 %v3887_v16  ;;  %v3934_v15 = vld [vmem:[#allocation2 + $0x588] sm:$0xff]   ;;  %v3935_v16 = vld [vmem:[#allocation2 + $0x550] sm:$0xff]  }
  0x8b   :  { %3547 = vmatprep.subr.bf16.mxu1 %v3888_v17  ;;  %v3936_v17 = vld [vmem:[#allocation2 + $0x5d0] sm:$0xff]  }
  0x8d   :  { %3526 = vmatpush3.bf16.msra.mxu0 %v3889_v18  ;;  %v3937_v18 = vld [vmem:[#allocation2 + $0x510] sm:$0xff]  }
  0x8e   :  { %3548 = vmatpush3.bf16.msra.mxu1 %v3890_v19  ;;  %3527 = vmatprep.subr.bf16.mxu0 %v3891_v20  ;;  %v3938_v19 = vld [vmem:[#allocation2 + $0x590] sm:$0xff]   ;;  %v3939_v20 = vld [vmem:[#allocation2 + $0x558] sm:$0xff]  }
  0x8f   :  { %3549 = vmatprep.subr.bf16.mxu1 %v3892_v21  ;;  %v3940_v21 = vld [vmem:[#allocation2 + $0x5d8] sm:$0xff]  }
  0x91   :  { %3528 = vmatpush3.bf16.msra.mxu0 %v3893_v22  ;;  %v3941_v22 = vld [vmem:[#allocation2 + $0x518] sm:$0xff]  }
  0x92   :  { %3550 = vmatpush3.bf16.msra.mxu1 %v3894_v23  ;;  %3557 = vmatprep.subr.bf16.mxu0 %v3895_v32  ;;  %v3942_v23 = vld [vmem:[#allocation2 + $0x598] sm:$0xff]   ;;  %v3951_v32 = vld [vmem:[#allocation2 + $0x570] sm:$0xff]  }
  0x93   :  { %3579 = vmatprep.subr.bf16.mxu1 %v3896_v33  ;;  %v3952_v33 = vld [vmem:[#allocation2 + $0x5f0] sm:$0xff]  }
  0x94   :  { %2561 = vmatmul.mubr.bf16.vlgmr.msra.gmra.mrb[12].mxu0 %v3096_v27  ;;  %v3946_v27 = vld [vmem:[#allocation2 + $0x5a0] sm:$0xff]  }
  0x95   :  { %2602 = vmatmul.mubr.bf16.vlgmr.msra.gmra.mrb[12].mxu1 %v3098_v30  ;;  %3558 = vmatpush3.bf16.msra.mxu0 %v3897_v34  ;;  %v3949_v30 = vld [vmem:[#allocation2 + $0x528] sm:$0xff]   ;;  %v3953_v34 = vld [vmem:[#allocation2 + $0x530] sm:$0xff]  }
  0x96   :  { %3580 = vmatpush3.bf16.msra.mxu1 %v3898_v35  ;;  %3559 = vmatprep.subr.bf16.mxu0 %v3899_v36  ;;  %v3954_v35 = vld [vmem:[#allocation2 + $0x5b0] sm:$0xff]   ;;  %v3955_v36 = vld [vmem:[#allocation2 + $0x578] sm:$0xff]  }
  0x97   :  { %3581 = vmatprep.subr.bf16.mxu1 %v3900_v37  ;;  %2642 = vmatprep.mubr.bf16.mxu0 %v3101_v3  ;;  %v3956_v37 = vld [vmem:[#allocation2 + $0x5f8] sm:$0xff]   ;;  %v3978_v3 = vld [vmem:[#allocation2 + $0x6a0] sm:$0xff]  }
  0x98   :  { %2683 = vmatprep.mubr.bf16.mxu1 %v3103_v7  ;;  %v3982_v7 = vld [vmem:[#allocation2 + $0x6a8] sm:$0xff]  }
  0x99   :  { %3560 = vmatpush3.bf16.msra.mxu0 %v3901_v38  ;;  %v3957_v38 = vld [vmem:[#allocation2 + $0x538] sm:$0xff]  }
  0x9a   :  { %3582 = vmatpush3.bf16.msra.mxu1 %v3902_v39  ;;  %3561 = vmatprep.subr.bf16.mxu0 %v3903_v40  ;;  %v3958_v39 = vld [vmem:[#allocation2 + $0x5b8] sm:$0xff]   ;;  %v45_v40 = vld [vmem:[%s4234_s0 + $0x50] sm:$0xff] }
  0x9b   :  { %3583 = vmatprep.subr.bf16.mxu1 %v3904_v41  ;;  %v61_v41 = vld [vmem:[%s4234_s0 + $0xd0] sm:$0xff] }
  0x9d   :  { %3562 = vmatpush3.bf16.msra.mxu0 %v3905_v42  ;;  %v46_v42 = vld [vmem:[%s4234_s0 + $0x58] sm:$0xff] }
  0x9e   :  { %3584 = vmatpush3.bf16.msra.mxu1 %v3906_v43  ;;  %3563 = vmatprep.subr.bf16.mxu0 %v3907_v44  ;;  %v62_v43 = vld [vmem:[%s4234_s0 + $0xd8] sm:$0xff]  ;;  %v3104_v44 = vcombine.low %v45_v40, %v61_v41 }
  0x9f   :  { %3585 = vmatprep.subr.bf16.mxu1 %v3908_v45  ;;  %v3105_v45 = vcombine.high %v45_v40, %v61_v41  ;;  %v4006_v41 = vld [vmem:[#allocation2 + $0x798] sm:$0xff]  }
  0xa1   :  { %3564 = vmatpush3.bf16.msra.mxu0 %v3909_v46  ;;  %v3106_v46 = vcombine.low %v46_v42, %v62_v43 }
  0xa2   :  { %3586 = vmatpush3.bf16.msra.mxu1 %v3910_v47  ;;  %3565 = vmatprep.subr.bf16.mxu0 %v3911_v48  ;;  %v3107_v47 = vcombine.high %v46_v42, %v62_v43  ;;  %v3959_v48 = vld [vmem:[#allocation2 + $0x640] sm:$0xff]  }
  0xa3   :  { %3587 = vmatprep.subr.bf16.mxu1 %v3912_v49  ;;  %v3960_v49 = vld [vmem:[#allocation2 + $0x6c0] sm:$0xff]  }
  0xa4   :  { %v4007_v43 = vld [vmem:[#allocation2 + $0x760] sm:$0xff]  }
  0xa5   :  { %3566 = vmatpush3.bf16.msra.mxu0 %v3913_v50  ;;  %v3961_v50 = vld [vmem:[#allocation2 + $0x600] sm:$0xff]  }
  0xa6   :  { %3588 = vmatpush3.bf16.msra.mxu1 %v3914_v51  ;;  %3567 = vmatprep.subr.bf16.mxu0 %v3915_v52  ;;  %v3962_v51 = vld [vmem:[#allocation2 + $0x680] sm:$0xff]   ;;  %v3963_v52 = vld [vmem:[#allocation2 + $0x648] sm:$0xff]  }
  0xa7   :  { %3589 = vmatprep.subr.bf16.mxu1 %v3916_v53  ;;  %v3964_v53 = vld [vmem:[#allocation2 + $0x6c8] sm:$0xff]  }
  0xa9   :  { %3568 = vmatpush3.bf16.msra.mxu0 %v3917_v54  ;;  %v3965_v54 = vld [vmem:[#allocation2 + $0x608] sm:$0xff]  }
  0xaa   :  { %3590 = vmatpush3.bf16.msra.mxu1 %v3918_v55  ;;  %3569 = vmatprep.subr.bf16.mxu0 %v3919_v56  ;;  %v3966_v55 = vld [vmem:[#allocation2 + $0x688] sm:$0xff]   ;;  %v3967_v56 = vld [vmem:[#allocation2 + $0x650] sm:$0xff]  }
  0xab   :  { %3591 = vmatprep.subr.bf16.mxu1 %v3920_v57  ;;  %v3968_v57 = vld [vmem:[#allocation2 + $0x6d0] sm:$0xff]  }
  0xad   :  { %3570 = vmatpush3.bf16.msra.mxu0 %v3921_v58  ;;  %v3969_v58 = vld [vmem:[#allocation2 + $0x610] sm:$0xff]  }
  0xae   :  { %3592 = vmatpush3.bf16.msra.mxu1 %v3922_v59  ;;  %3571 = vmatprep.subr.bf16.mxu0 %v3923_v60  ;;  %v3970_v59 = vld [vmem:[#allocation2 + $0x690] sm:$0xff]   ;;  %v3971_v60 = vld [vmem:[#allocation2 + $0x658] sm:$0xff]  }
  0xaf   :  { %3593 = vmatprep.subr.bf16.mxu1 %v3924_v61  ;;  %v3972_v61 = vld [vmem:[#allocation2 + $0x6d8] sm:$0xff]  }
  0xb1   :  { %3572 = vmatpush3.bf16.msra.mxu0 %v3925_v62  ;;  %v3973_v62 = vld [vmem:[#allocation2 + $0x618] sm:$0xff]  }
  0xb2   :  { %3594 = vmatpush3.bf16.msra.mxu1 %v3926_v63  ;;  %3601 = vmatprep.subr.bf16.mxu0 %v3927_v8  ;;  %v3974_v63 = vld [vmem:[#allocation2 + $0x698] sm:$0xff]   ;;  %v3983_v8 = vld [vmem:[#allocation2 + $0x670] sm:$0xff]  }
  0xb3   :  { %3623 = vmatprep.subr.bf16.mxu1 %v3928_v9  ;;  %v3984_v9 = vld [vmem:[#allocation2 + $0x6f0] sm:$0xff]  }
  0xb4   :  { %2643 = vmatmul.mubr.bf16.vlgmr.msra.gmra.mrb[16].mxu0 %v3100_v2  ;;  %v3977_v2 = vld [vmem:[#allocation2 + $0x620] sm:$0xff]  }
  0xb5   :  { %2684 = vmatmul.mubr.bf16.vlgmr.msra.gmra.mrb[16].mxu1 %v3102_v6  ;;  %3602 = vmatpush3.bf16.msra.mxu0 %v3929_v10  ;;  %v3981_v6 = vld [vmem:[#allocation2 + $0x628] sm:$0xff]   ;;  %v3985_v10 = vld [vmem:[#allocation2 + $0x630] sm:$0xff]  }
  0xb6   :  { %3624 = vmatpush3.bf16.msra.mxu1 %v3930_v11  ;;  %3603 = vmatprep.subr.bf16.mxu0 %v3931_v12  ;;  %v3986_v11 = vld [vmem:[#allocation2 + $0x6b0] sm:$0xff]   ;;  %v3987_v12 = vld [vmem:[#allocation2 + $0x678] sm:$0xff]  }
  0xb7   :  { %3625 = vmatprep.subr.bf16.mxu1 %v3932_v13  ;;  %2724 = vmatprep.mubr.bf16.mxu0 %v3105_v45  ;;  %v3988_v13 = vld [vmem:[#allocation2 + $0x6f8] sm:$0xff]  }
  0xb8   :  { %2765 = vmatprep.mubr.bf16.mxu1 %v3107_v47 }
  0xb9   :  { %3604 = vmatpush3.bf16.msra.mxu0 %v3933_v14  ;;  %v3989_v14 = vld [vmem:[#allocation2 + $0x638] sm:$0xff]  }
  0xba   :  { %3626 = vmatpush3.bf16.msra.mxu1 %v3934_v15  ;;  %3605 = vmatprep.subr.bf16.mxu0 %v3935_v16  ;;  %v3990_v15 = vld [vmem:[#allocation2 + $0x6b8] sm:$0xff]   ;;  %v47_v16 = vld [vmem:[%s4234_s0 + $0x60] sm:$0xff] }
  0xbb   :  { %3627 = vmatprep.subr.bf16.mxu1 %v3936_v17  ;;  %v63_v17 = vld [vmem:[%s4234_s0 + $0xe0] sm:$0xff] }
  0xbd   :  { %3606 = vmatpush3.bf16.msra.mxu0 %v3937_v18  ;;  %v48_v18 = vld [vmem:[%s4234_s0 + $0x68] sm:$0xff] }
  0xbe   :  { %3628 = vmatpush3.bf16.msra.mxu1 %v3938_v19  ;;  %3607 = vmatprep.subr.bf16.mxu0 %v3939_v20  ;;  %v3108_v19 = vcombine.low %v47_v16, %v63_v17  ;;  %v3109_v20 = vcombine.high %v47_v16, %v63_v17 }
  0xbf   :  { %3629 = vmatprep.subr.bf16.mxu1 %v3940_v21  ;;  %v64_v21 = vld [vmem:[%s4234_s0 + $0xe8] sm:$0xff] }
  0xc1   :  { %3608 = vmatpush3.bf16.msra.mxu0 %v3941_v22  ;;  %v3110_v22 = vcombine.low %v48_v18, %v64_v21 }
  0xc2   :  { %3630 = vmatpush3.bf16.msra.mxu1 %v3942_v23  ;;  %3609 = vmatprep.subr.bf16.mxu0 %v3943_v24  ;;  %v3111_v23 = vcombine.high %v48_v18, %v64_v21  ;;  %v3991_v24 = vld [vmem:[#allocation2 + $0x740] sm:$0xff]  }
  0xc3   :  { %3631 = vmatprep.subr.bf16.mxu1 %v3944_v25  ;;  %v3992_v25 = vld [vmem:[#allocation2 + $0x7c0] sm:$0xff]  }
  0xc5   :  { %3610 = vmatpush3.bf16.msra.mxu0 %v3945_v26  ;;  %v3993_v26 = vld [vmem:[#allocation2 + $0x700] sm:$0xff]  }
  0xc6   :  { %3632 = vmatpush3.bf16.msra.mxu1 %v3946_v27  ;;  %3611 = vmatprep.subr.bf16.mxu0 %v3947_v28  ;;  %v3994_v27 = vld [vmem:[#allocation2 + $0x780] sm:$0xff]   ;;  %v3995_v28 = vld [vmem:[#allocation2 + $0x748] sm:$0xff]  }
  0xc7   :  { %3633 = vmatprep.subr.bf16.mxu1 %v3948_v29  ;;  %v3996_v29 = vld [vmem:[#allocation2 + $0x7c8] sm:$0xff]  }
  0xc9   :  { %3612 = vmatpush3.bf16.msra.mxu0 %v3949_v30  ;;  %v3997_v30 = vld [vmem:[#allocation2 + $0x708] sm:$0xff]  }
  0xca   :  { %3634 = vmatpush3.bf16.msra.mxu1 %v3950_v31  ;;  %3613 = vmatprep.subr.bf16.mxu0 %v3951_v32  ;;  %v3998_v31 = vld [vmem:[#allocation2 + $0x788] sm:$0xff]   ;;  %v3999_v32 = vld [vmem:[#allocation2 + $0x750] sm:$0xff]  }
  0xcb   :  { %3635 = vmatprep.subr.bf16.mxu1 %v3952_v33  ;;  %v4000_v33 = vld [vmem:[#allocation2 + $0x7d0] sm:$0xff]  }
  0xcd   :  { %3614 = vmatpush3.bf16.msra.mxu0 %v3953_v34  ;;  %v4001_v34 = vld [vmem:[#allocation2 + $0x710] sm:$0xff]  }
  0xce   :  { %3636 = vmatpush3.bf16.msra.mxu1 %v3954_v35  ;;  %3615 = vmatprep.subr.bf16.mxu0 %v3955_v36  ;;  %v4002_v35 = vld [vmem:[#allocation2 + $0x790] sm:$0xff]   ;;  %v4003_v36 = vld [vmem:[#allocation2 + $0x758] sm:$0xff]  }
  0xcf   :  { %3637 = vmatprep.subr.bf16.mxu1 %v3956_v37  ;;  %v4004_v37 = vld [vmem:[#allocation2 + $0x7d8] sm:$0xff]  }
  0xd1   :  { %3616 = vmatpush3.bf16.msra.mxu0 %v3957_v38 }
  0xd2   :  { %3638 = vmatpush3.bf16.msra.mxu1 %v3958_v39  ;;  %3645 = vmatprep.subr.bf16.mxu0 %v3959_v48  ;;  %v4005_v39 = vld [vmem:[#allocation2 + $0x718] sm:$0xff]  }
  0xd3   :  { %3667 = vmatprep.subr.bf16.mxu1 %v3960_v49  ;;  %v4009_v49 = vld [vmem:[#allocation2 + $0x720] sm:$0xff]  }
  0xd4   :  { %2725 = vmatmul.mubr.bf16.vlgmr.msra.gmra.mrb[20].mxu0 %v3104_v44 }
  0xd5   :  { %2766 = vmatmul.mubr.bf16.vlgmr.msra.gmra.mrb[20].mxu1 %v3106_v46  ;;  %3646 = vmatpush3.bf16.msra.mxu0 %v3961_v50  ;;  %v4008_v46 = vld [vmem:[#allocation2 + $0x7e0] sm:$0xff]  }
  0xd6   :  { %3668 = vmatpush3.bf16.msra.mxu1 %v3962_v51  ;;  %3647 = vmatprep.subr.bf16.mxu0 %v3963_v52  ;;  %v4010_v51 = vld [vmem:[#allocation2 + $0x7a0] sm:$0xff]  }
  0xd7   :  { %3669 = vmatprep.subr.bf16.mxu1 %v3964_v53  ;;  %2806 = vmatprep.mubr.bf16.mxu0 %v3109_v20  ;;  %v3083_v52 = vld [vmem:[%s4236_s2] ss:$0 sm:$0xff] }
  0xd8   :  { %2847 = vmatprep.mubr.bf16.mxu1 %v3111_v23 }
  0xd9   :  { %3648 = vmatpush3.bf16.msra.mxu0 %v3965_v54 }
  0xda   :  { %3670 = vmatpush3.bf16.msra.mxu1 %v3966_v55  ;;  %3649 = vmatprep.subr.bf16.mxu0 %v3967_v56  ;;  %v4011_v55 = vld [vmem:[#allocation2 + $0x768] sm:$0xff]  }
  0xdb   :  { %3671 = vmatprep.subr.bf16.mxu1 %v3968_v57 }
  0xdd   :  { %3650 = vmatpush3.bf16.msra.mxu0 %v3969_v58  ;;  %v4012_v58 = vld [vmem:[#allocation2 + $0x7e8] sm:$0xff]  }
  0xde   :  { %3672 = vmatpush3.bf16.msra.mxu1 %v3970_v59  ;;  %3651 = vmatprep.subr.bf16.mxu0 %v3971_v60 }
  0xdf   :  { %3673 = vmatprep.subr.bf16.mxu1 %v3972_v61  ;;  %v4013_v61 = vld [vmem:[#allocation2 + $0x728] sm:$0xff]  }
  0xe1   :  { %3652 = vmatpush3.bf16.msra.mxu0 %v3973_v62 }
  0xe2   :  { %3674 = vmatpush3.bf16.msra.mxu1 %v3974_v63  ;;  %3653 = vmatprep.subr.bf16.mxu0 %v3975_v0  ;;  %v4014_v63 = vld [vmem:[#allocation2 + $0x7a8] sm:$0xff]  }
  0xe3   :  { %3675 = vmatprep.subr.bf16.mxu1 %v3976_v1  ;;  %v4015_v1 = vld [vmem:[#allocation2 + $0x770] sm:$0xff]  }
  0xe5   :  { %3654 = vmatpush3.bf16.msra.mxu0 %v3977_v2  ;;  %v4016_v2 = vld [vmem:[#allocation2 + $0x7f0] sm:$0xff]  }
  0xe6   :  { %3676 = vmatpush3.bf16.msra.mxu1 %v3978_v3  ;;  %3655 = vmatprep.subr.bf16.mxu0 %v3979_v4  ;;  %v4017_v3 = vld [vmem:[#allocation2 + $0x730] sm:$0xff]  }
  0xe7   :  { %3677 = vmatprep.subr.bf16.mxu1 %v3980_v5  ;;  %v4018_v4 = vld [vmem:[#allocation2 + $0x7b0] sm:$0xff]   ;;  %v4019_v5 = vld [vmem:[#allocation2 + $0x778] sm:$0xff]  }
  0xe9   :  { %3656 = vmatpush3.bf16.msra.mxu0 %v3981_v6  ;;  %v4020_v6 = vld [vmem:[#allocation2 + $0x7f8] sm:$0xff]  }
  0xea   :  { %3678 = vmatpush3.bf16.msra.mxu1 %v3982_v7  ;;  %3657 = vmatprep.subr.bf16.mxu0 %v3983_v8  ;;  %v4021_v7 = vld [vmem:[#allocation2 + $0x738] sm:$0xff]  }
  0xeb   :  { %3679 = vmatprep.subr.bf16.mxu1 %v3984_v9  ;;  %v4022_v8 = vld [vmem:[#allocation2 + $0x7b8] sm:$0xff]   ;;  %v49_v9 = vld [vmem:[%s4234_s0 + $0x70] sm:$0xff] }
  0xed   :  { %3658 = vmatpush3.bf16.msra.mxu0 %v3985_v10  ;;  %v65_v10 = vld [vmem:[%s4234_s0 + $0xf0] sm:$0xff] }
  0xee   :  { %3680 = vmatpush3.bf16.msra.mxu1 %v3986_v11  ;;  %3659 = vmatprep.subr.bf16.mxu0 %v3987_v12  ;;  %v50_v11 = vld [vmem:[%s4234_s0 + $0x78] sm:$0xff] }
  0xef   :  { %3681 = vmatprep.subr.bf16.mxu1 %v3988_v13  ;;  %v66_v12 = vld [vmem:[%s4234_s0 + $0xf8] sm:$0xff]  ;;  %v3112_v13 = vcombine.low %v49_v9, %v65_v10 }
  0xf0   :  { %v3115_v16 = vcombine.high %v50_v11, %v66_v12 }
  0xf1   :  { %3660 = vmatpush3.bf16.msra.mxu0 %v3989_v14  ;;  %v3113_v14 = vcombine.high %v49_v9, %v65_v10  ;;  %v4030_v9 = vld [vmem:[%s4237_s3 + $0x38] sm:$0xff]  }
  0xf2   :  { %3682 = vmatpush3.bf16.msra.mxu1 %v3990_v15  ;;  %3689 = vmatprep.subr.bf16.mxu0 %v3991_v24  ;;  %v3114_v15 = vcombine.low %v50_v11, %v66_v12 }
  0xf3   :  { %3711 = vmatprep.subr.bf16.mxu1 %v3992_v25 }
  0xf4   :  { %2807 = vmatmul.mubr.bf16.vlgmr.msra.gmra.mrb[24].mxu0 %v3108_v19 }
  0xf5   :  { %2848 = vmatmul.mubr.bf16.vlgmr.msra.gmra.mrb[24].mxu1 %v3110_v22  ;;  %3690 = vmatpush3.bf16.msra.mxu0 %v3993_v26 }
  0xf6   :  { %3712 = vmatpush3.bf16.msra.mxu1 %v3994_v27  ;;  %3691 = vmatprep.subr.bf16.mxu0 %v3995_v28 }
  0xf7   :  { %3713 = vmatprep.subr.bf16.mxu1 %v3996_v29  ;;  %2888 = vmatprep.mubr.bf16.mxu0 %v3113_v14 }
  0xf8   :  { %2929 = vmatprep.mubr.bf16.mxu1 %v3115_v16 }
  0xf9   :  { %3692 = vmatpush3.bf16.msra.mxu0 %v3997_v30 }
  0xfa   :  { %3714 = vmatpush3.bf16.msra.mxu1 %v3998_v31  ;;  %3693 = vmatprep.subr.bf16.mxu0 %v3999_v32 }
  0xfb   :  { %3715 = vmatprep.subr.bf16.mxu1 %v4000_v33 }
  0xfd   :  { %3694 = vmatpush3.bf16.msra.mxu0 %v4001_v34 }
  0xfe   :  { %3716 = vmatpush3.bf16.msra.mxu1 %v4002_v35  ;;  %3695 = vmatprep.subr.bf16.mxu0 %v4003_v36 }
  0xff   :  { %3717 = vmatprep.subr.bf16.mxu1 %v4004_v37 }
 0x101   :  { %3696 = vmatpush3.bf16.msra.mxu0 %v4005_v39 }
 0x102   :  { %3718 = vmatpush3.bf16.msra.mxu1 %v4006_v41  ;;  %3697 = vmatprep.subr.bf16.mxu0 %v4007_v43 }
 0x103   :  { %3719 = vmatprep.subr.bf16.mxu1 %v4008_v46 }
 0x105   :  { %3698 = vmatpush3.bf16.msra.mxu0 %v4009_v49  ;;  %v4023_v49 = vld [vmem:[%s4237_s3] sm:$0xff]  }
 0x106   :  { %3720 = vmatpush3.bf16.msra.mxu1 %v4010_v51  ;;  %3699 = vmatprep.subr.bf16.mxu0 %v4011_v55  ;;  %v4024_v51 = vld [vmem:[%s4237_s3 + $0x8] sm:$0xff]  }
 0x107   :  { %v3397_v38 = vpop.f32.mrb[0].mxu0  ;;  %3721 = vmatprep.subr.bf16.mxu1 %v4012_v58 }
 0x108   :  { %v3419_v40 = vpop.f32.mrb[0].mxu1  ;;  %v3398_v42 = vpop.f32.mrb[1].mxu0 }
 0x109   :  { %v3399_v44 = vadd.f32 %v3398_v42, %v3397_v38  ;;  %v3420_v45 = vpop.f32.mrb[1].mxu1  ;;  %v3400_v48 = vpop.f32.mrb[2].mxu0  ;;  %3700 = vmatpush3.bf16.msra.mxu0 %v4013_v61 }
 0x10a   :  { %v3421_v47 = vadd.f32 %v3420_v45, %v3419_v40  ;;  %v3422_v50 = vpop.f32.mrb[2].mxu1  ;;  %v3401_v53 = vpop.f32.mrb[3].mxu0  ;;  %3722 = vmatpush3.bf16.msra.mxu1 %v4014_v63  ;;  %3701 = vmatprep.subr.bf16.mxu0 %v4015_v1 }
 0x10b   :  { %v2317_v54 = vadd.f32 %v3399_v44, %v3083_v52  ;;  %v3402_v56 = vadd.f32 %v3401_v53, %v3400_v48  ;;  %v3423_v57 = vpop.f32.mrb[3].mxu1  ;;  %3723 = vmatprep.subr.bf16.mxu1 %v4016_v2  ;;  %v4026_v53 = vld [vmem:[%s4237_s3 + $0x18] sm:$0xff]  }
 0x10c   :  { %v3424_v59 = vadd.f32 %v3423_v57, %v3422_v50  ;;  %v4058_v50 = vmov 0.0  }
 0x10d   :  { %v2358_v60 = vadd.f32 %v3421_v47, %v2317_v54  ;;  %v2320_v62 = vadd.f32 %v3402_v56, %v3083_v52  ;;  %3702 = vmatpush3.bf16.msra.mxu0 %v4017_v3  ;;  %v4025_v52 = vld [vmem:[%s4237_s3 + $0x10] sm:$0xff]   ;;  %v4027_v54 = vld [vmem:[%s4237_s3 + $0x20] sm:$0xff]  }
 0x10e   :  { %3724 = vmatpush3.bf16.msra.mxu1 %v4018_v4  ;;  %3703 = vmatprep.subr.bf16.mxu0 %v4019_v5 }
 0x10f   :  { %v2361_v0 = vadd.f32 %v3424_v59, %v2320_v62  ;;  %3725 = vmatprep.subr.bf16.mxu1 %v4020_v6  ;;  %v4028_v6 = vld [vmem:[%s4237_s3 + $0x28] sm:$0xff]  }
 0x111   :  { %3704 = vmatpush3.bf16.msra.mxu0 %v4021_v7 }
 0x112   :  { %3726 = vmatpush3.bf16.msra.mxu1 %v4022_v8  ;;  %3742 = vmatprep.subr.bf16.mxu0 %v4058_v50  ;;  %v4029_v8 = vld [vmem:[%s4237_s3 + $0x30] sm:$0xff]  }
 0x114   :  { %2889 = vmatmul.mubr.bf16.vlgmr.msra.gmra.mrb[28].mxu0 %v3112_v13 }
 0x115   :  { %2930 = vmatmul.mubr.bf16.vlgmr.msra.gmra.mrb[28].mxu1 %v3114_v15  ;;  %3743 = vmatpush3.bf16.msra.mxu0 %v4023_v49 }
 0x116   :  { %3744 = vmatprep.subr.bf16.mxu0 %v4058_v50  ;;  %3758 = vmatprep.mubr.msk.bf16.mxu0 %vm4059_vm0, %v4058_v50 }
 0x119   :  { %3745 = vmatpush3.bf16.msra.mxu0 %v4024_v51 }
 0x11a   :  { %3746 = vmatprep.subr.bf16.mxu0 %v4058_v50 }
 0x11d   :  { %3747 = vmatpush3.bf16.msra.mxu0 %v4025_v52 }
 0x11e   :  { %3748 = vmatprep.subr.bf16.mxu0 %v4058_v50 }
 0x121   :  { %3749 = vmatpush3.bf16.msra.mxu0 %v4026_v53 }
 0x122   :  { %3750 = vmatprep.subr.bf16.mxu0 %v4058_v50 }
 0x125   :  { %3751 = vmatpush3.bf16.msra.mxu0 %v4027_v54 }
 0x126   :  { %3752 = vmatprep.subr.bf16.mxu0 %v4058_v50 }
 0x127   :  { %v3441_v17 = vpop.f32.mrb[4].mxu0 }
 0x128   :  { %v3463_v18 = vpop.f32.mrb[4].mxu1  ;;  %v3442_v19 = vpop.f32.mrb[5].mxu0 }
 0x129   :  { %v3443_v20 = vadd.f32 %v3442_v19, %v3441_v17  ;;  %v3464_v21 = vpop.f32.mrb[5].mxu1  ;;  %v3444_v22 = vpop.f32.mrb[6].mxu0  ;;  %3753 = vmatpush3.bf16.msra.mxu0 %v4028_v6 }
 0x12a   :  { %v3465_v23 = vadd.f32 %v3464_v21, %v3463_v18  ;;  %v3466_v24 = vpop.f32.mrb[6].mxu1  ;;  %v3445_v25 = vpop.f32.mrb[7].mxu0  ;;  %3754 = vmatprep.subr.bf16.mxu0 %v4058_v50 }
 0x12b   :  { %v2399_v26 = vadd.f32 %v3443_v20, %v2358_v60  ;;  %v3446_v27 = vadd.f32 %v3445_v25, %v3444_v22  ;;  %v3467_v28 = vpop.f32.mrb[7].mxu1 }
 0x12c   :  { %v3468_v29 = vadd.f32 %v3467_v28, %v3466_v24 }
 0x12d   :  { %v2440_v30 = vadd.f32 %v3465_v23, %v2399_v26  ;;  %v2402_v31 = vadd.f32 %v3446_v27, %v2361_v0  ;;  %3755 = vmatpush3.bf16.msra.mxu0 %v4029_v8 }
 0x12e   :  { %3756 = vmatprep.subr.bf16.mxu0 %v4058_v50 }
 0x12f   :  { %v2443_v32 = vadd.f32 %v3468_v29, %v2402_v31 }
 0x131   :  { %3757 = vmatpush3.bf16.msra.mxu0 %v4030_v9 }
 0x147   :  { %v3485_v33 = vpop.f32.mrb[8].mxu0 }
 0x148   :  { %v3507_v34 = vpop.f32.mrb[8].mxu1  ;;  %v3486_v35 = vpop.f32.mrb[9].mxu0 }
 0x149   :  { %v3508_v36 = vpop.f32.mrb[9].mxu1  ;;  %v3487_v37 = vadd.f32 %v3486_v35, %v3485_v33  ;;  %v3488_v39 = vpop.f32.mrb[10].mxu0 }
 0x14a   :  { %v3509_v38 = vadd.f32 %v3508_v36, %v3507_v34  ;;  %v3510_v40 = vpop.f32.mrb[10].mxu1  ;;  %v3489_v41 = vpop.f32.mrb[11].mxu0 }
 0x14b   :  { %v3511_v42 = vpop.f32.mrb[11].mxu1  ;;  %v2481_v43 = vadd.f32 %v3487_v37, %v2440_v30  ;;  %v3490_v44 = vadd.f32 %v3489_v41, %v3488_v39 }
 0x14c   :  { %v3512_v45 = vadd.f32 %v3511_v42, %v3510_v40 }
 0x14d   :  { %v2522_v46 = vadd.f32 %v3509_v38, %v2481_v43  ;;  %v2484_v47 = vadd.f32 %v3490_v44, %v2443_v32 }
 0x14f   :  { %v2525_v48 = vadd.f32 %v3512_v45, %v2484_v47 }
 0x167   :  { %v3529_v55 = vpop.f32.mrb[12].mxu0 }
 0x168   :  { %v3551_v56 = vpop.f32.mrb[12].mxu1  ;;  %v3530_v57 = vpop.f32.mrb[13].mxu0 }
 0x169   :  { %v3531_v58 = vadd.f32 %v3530_v57, %v3529_v55  ;;  %v3552_v59 = vpop.f32.mrb[13].mxu1  ;;  %v3532_v60 = vpop.f32.mrb[14].mxu0 }
 0x16a   :  { %v3553_v61 = vadd.f32 %v3552_v59, %v3551_v56  ;;  %v3554_v62 = vpop.f32.mrb[14].mxu1  ;;  %v3533_v63 = vpop.f32.mrb[15].mxu0 }
 0x16b   :  { %v2563_v0 = vadd.f32 %v3531_v58, %v2522_v46  ;;  %v3534_v1 = vadd.f32 %v3533_v63, %v3532_v60  ;;  %v3555_v2 = vpop.f32.mrb[15].mxu1 }
 0x16c   :  { %v3556_v3 = vadd.f32 %v3555_v2, %v3554_v62 }
 0x16d   :  { %v2604_v4 = vadd.f32 %v3553_v61, %v2563_v0  ;;  %v2566_v5 = vadd.f32 %v3534_v1, %v2525_v48 }
 0x16f   :  { %v2607_v7 = vadd.f32 %v3556_v3, %v2566_v5 }
 0x187   :  { %v3573_v10 = vpop.f32.mrb[16].mxu0 }
 0x188   :  { %v3595_v11 = vpop.f32.mrb[16].mxu1  ;;  %v3574_v12 = vpop.f32.mrb[17].mxu0 }
 0x189   :  { %v3575_v13 = vadd.f32 %v3574_v12, %v3573_v10  ;;  %v3596_v14 = vpop.f32.mrb[17].mxu1  ;;  %v3576_v15 = vpop.f32.mrb[18].mxu0 }
 0x18a   :  { %v3597_v16 = vadd.f32 %v3596_v14, %v3595_v11  ;;  %v3598_v17 = vpop.f32.mrb[18].mxu1  ;;  %v3577_v18 = vpop.f32.mrb[19].mxu0 }
 0x18b   :  { %v2645_v19 = vadd.f32 %v3575_v13, %v2604_v4  ;;  %v3578_v20 = vadd.f32 %v3577_v18, %v3576_v15  ;;  %v3599_v21 = vpop.f32.mrb[19].mxu1  ;;  %v3380_v13 = vld [vmem:[%s4238_s4] ss:$0 sm:$0xff] }
 0x18c   :  { %v3600_v22 = vadd.f32 %v3599_v21, %v3598_v17 }
 0x18d   :  { %v2686_v23 = vadd.f32 %v3597_v16, %v2645_v19  ;;  %v2648_v24 = vadd.f32 %v3578_v20, %v2607_v7 }
 0x18f   :  { %v2689_v25 = vadd.f32 %v3600_v22, %v2648_v24 }
 0x1a7   :  { %v3617_v26 = vpop.f32.mrb[20].mxu0 }
 0x1a8   :  { %v3639_v27 = vpop.f32.mrb[20].mxu1  ;;  %v3618_v28 = vpop.f32.mrb[21].mxu0 }
 0x1a9   :  { %v3640_v29 = vpop.f32.mrb[21].mxu1  ;;  %v3619_v30 = vadd.f32 %v3618_v28, %v3617_v26  ;;  %v3620_v32 = vpop.f32.mrb[22].mxu0 }
 0x1aa   :  { %v3641_v31 = vadd.f32 %v3640_v29, %v3639_v27  ;;  %v3642_v33 = vpop.f32.mrb[22].mxu1  ;;  %v3621_v34 = vpop.f32.mrb[23].mxu0 }
 0x1ab   :  { %v3643_v35 = vpop.f32.mrb[23].mxu1  ;;  %v2727_v36 = vadd.f32 %v3619_v30, %v2686_v23  ;;  %v3622_v37 = vadd.f32 %v3621_v34, %v3620_v32 }
 0x1ac   :  { %v3644_v38 = vadd.f32 %v3643_v35, %v3642_v33 }
 0x1ad   :  { %v2768_v39 = vadd.f32 %v3641_v31, %v2727_v36  ;;  %v2730_v40 = vadd.f32 %v3622_v37, %v2689_v25 }
 0x1af   :  { %v2771_v41 = vadd.f32 %v3644_v38, %v2730_v40 }
 0x1c7   :  { %v3661_v42 = vpop.f32.mrb[24].mxu0 }
 0x1c8   :  { %v3683_v43 = vpop.f32.mrb[24].mxu1  ;;  %v3662_v44 = vpop.f32.mrb[25].mxu0 }
 0x1c9   :  { %v3663_v45 = vadd.f32 %v3662_v44, %v3661_v42  ;;  %v3684_v46 = vpop.f32.mrb[25].mxu1  ;;  %v3664_v47 = vpop.f32.mrb[26].mxu0 }
 0x1ca   :  { %v3685_v48 = vadd.f32 %v3684_v46, %v3683_v43  ;;  %v3686_v49 = vpop.f32.mrb[26].mxu1  ;;  %v3665_v50 = vpop.f32.mrb[27].mxu0 }
 0x1cb   :  { %v2809_v51 = vadd.f32 %v3663_v45, %v2768_v39  ;;  %v3666_v52 = vadd.f32 %v3665_v50, %v3664_v47  ;;  %v3687_v53 = vpop.f32.mrb[27].mxu1 }
 0x1cc   :  { %v3688_v54 = vadd.f32 %v3687_v53, %v3686_v49 }
 0x1cd   :  { %v2850_v55 = vadd.f32 %v3685_v48, %v2809_v51  ;;  %v2812_v56 = vadd.f32 %v3666_v52, %v2771_v41 }
 0x1cf   :  { %v2853_v57 = vadd.f32 %v3688_v54, %v2812_v56 }
 0x1e7   :  { %v3705_v58 = vpop.f32.mrb[28].mxu0 }
 0x1e8   :  { %v3727_v59 = vpop.f32.mrb[28].mxu1  ;;  %v3706_v60 = vpop.f32.mrb[29].mxu0 }
 0x1e9   :  { %v3728_v61 = vpop.f32.mrb[29].mxu1  ;;  %v3707_v62 = vadd.f32 %v3706_v60, %v3705_v58  ;;  %v3708_v0 = vpop.f32.mrb[30].mxu0 }
 0x1ea   :  { %v3729_v63 = vadd.f32 %v3728_v61, %v3727_v59  ;;  %v3730_v1 = vpop.f32.mrb[30].mxu1  ;;  %v3709_v2 = vpop.f32.mrb[31].mxu0 }
 0x1eb   :  { %v3731_v3 = vpop.f32.mrb[31].mxu1  ;;  %v2891_v4 = vadd.f32 %v3707_v62, %v2850_v55  ;;  %v3710_v5 = vadd.f32 %v3709_v2, %v3708_v0 }
 0x1ec   :  { %v3732_v6 = vadd.f32 %v3731_v3, %v3730_v1 }
 0x1ed   :  { %v2932_v7 = vadd.f32 %v3729_v63, %v2891_v4  ;;  %v2894_v8 = vadd.f32 %v3710_v5, %v2853_v57 }
 0x1ef   :  { %v2935_v9 = vadd.f32 %v3732_v6, %v2894_v8  ;;  %v2938_v10 = vmax.f32 %v2932_v7, 0.0 }
 0x1f1   :  { %v2939_v11 = vmax.f32 %v2935_v9, 0.0 }
 0x1f3   :  { %v2940_v12 = vpack.c.bf16 %v2939_v11, %v2938_v10 }
 0x1f5   :  { %3759 = vmatmul.mubr.bf16.vlgmr.msra.gmra.mrb[32].mxu0 %v2940_v12 }
 0x2c8   :  { %v3039_v14 = vpop.f32.mrb[32].mxu0 }
 0x2c9   :  { %v3074_v15 = vadd.f32 %v3380_v13, %v3039_v14  ;;  %v3760_v16 = vpop.f32.mrb[33].mxu0 }
 0x2ca   :  { %v3042_v17 = vpop.f32.mrb[34].mxu0 }
 0x2cb   :  { %3076 = vst [vmem:[%s4239_s5] sm:$0xff] %v3074_v15  ;;  %v3075_v18 = vadd.f32 %v3380_v13, %v3042_v17  ;;  %v3761_v19 = vpop.f32.mrb[35].mxu0 }
 0x2cd   :  { %3077 = vst [vmem:[%s4239_s5 + $0x8] sm:$0xff] %v3075_v18 }
 0x2ce   :  { %3082 = vsyncpa [#allocation3], 1 }

</bundles_post_ra>
